<compile_context>
chip_gen: v7x
topology: tpu7x:2x2x1
jax: 0.10.0
libtpu: 0.0.40
codegen_flags: <defaults>
</compile_context>

<pallas_src>
import math
import functools

import jax
import jax.numpy as jnp
from jax import lax
from jax.experimental import pallas as pl
from jax.experimental.pallas import tpu as pltpu


# ----------------------------- in-kernel helpers -----------------------------

def _layernorm(x, g, b, eps=1e-5):
    mu = jnp.mean(x, axis=-1, keepdims=True)
    xc = x - mu
    var = jnp.mean(xc * xc, axis=-1, keepdims=True)
    return xc * lax.rsqrt(var + eps) * g + b


def _softmax_last(x):
    m = jnp.max(x, axis=-1, keepdims=True)
    e = jnp.exp(x - m)
    return e * pl.reciprocal(jnp.sum(e, axis=-1, keepdims=True), approx=True)


# --------------------------------- kernel ------------------------------------

def encoder_stack_kernel(nhead,
                         src_ref,
                         wqkv_ref, bqkv_ref, wo_ref, bo_ref,
                         ln1g_ref, ln1b_ref,
                         w1_ref, b1_ref, w2_ref, b2_ref,
                         ln2g_ref, ln2b_ref,
                         lnfg_ref, lnfb_ref,
                         out_ref,
                         x_ref):
    """One (batch element, layer) grid step of the TransformerEncoder stack."""
    l = pl.program_id(1)
    S, E = x_ref.shape
    dh = E // nhead

    # Load this batch element's input into the layer-carry scratch at layer 0.
    @pl.when(l == 0)
    def _():
        x_ref[...] = src_ref[0]

    x = x_ref[...]                                               # (S, E) f32

    # ------------------ multi-head self-attention ------------------
    # Fused QKV projection; 1/sqrt(dh) already folded into the Q columns.
    qkv = jnp.dot(x.astype(jnp.bfloat16), wqkv_ref[0],
                  preferred_element_type=jnp.float32) + bqkv_ref[0]   # (S, 3E)

    def heads(t2d):                                              # (S,E)->(H,S,dh)
        return jnp.stack(
            [t2d[:, h * dh:(h + 1) * dh] for h in range(nhead)], axis=0
        ).astype(jnp.bfloat16)

    q = heads(qkv[:, 0:E])
    k = heads(qkv[:, E:2 * E])
    v = heads(qkv[:, 2 * E:3 * E])

    s = jnp.einsum('hqd,hkd->hqk', q, k,
                   preferred_element_type=jnp.float32)           # (H, S, S)
    p = _softmax_last(s)
    ctx = jnp.einsum('hqk,hkd->hqd', p.astype(jnp.bfloat16), v,
                     preferred_element_type=jnp.float32)         # (H, S, dh)
    # concat heads back onto the lane axis: (H, S, dh) -> (S, E)
    ctx = jnp.concatenate([ctx[h] for h in range(nhead)], axis=-1)
    attn = jnp.dot(ctx.astype(jnp.bfloat16), wo_ref[0],
                   preferred_element_type=jnp.float32) + bo_ref[0]

    # -------- post-norm residual blocks (dropout = identity) --------
    x = _layernorm(x + attn, ln1g_ref[0], ln1b_ref[0])
    ff = jnp.maximum(
        jnp.dot(x.astype(jnp.bfloat16), w1_ref[0],
                preferred_element_type=jnp.float32) + b1_ref[0], 0.0)
    ff = jnp.dot(ff.astype(jnp.bfloat16), w2_ref[0],
                 preferred_element_type=jnp.float32) + b2_ref[0]
    x = _layernorm(x + ff, ln2g_ref[0], ln2b_ref[0])

    x_ref[...] = x                                               # carry to next layer

    # Final encoder LayerNorm + single HBM store at the last layer step.
    @pl.when(l == pl.num_programs(1) - 1)
    def _():
        out_ref[0] = _layernorm(x, lnfg_ref[...],
                                lnfb_ref[...]).astype(out_ref.dtype)


# ------------------------------ pallas wrapper --------------------------------

def my_transformer_encoder_forward(params, src, *, nhead, num_layers):
    """src: (S, N, E) as in PyTorch; returns (S, N, E)."""
    S, N, E = src.shape
    F = params['w1'].shape[-1]
    # Batch-first so the batch axis is a leading grid dimension; the two tiny
    # XLA transposes are negligible next to the fused kernel.
    src_nse = jnp.transpose(src, (1, 0, 2))                      # (N, S, E)

    def wmap(n, l):     # per-layer weights: streamed (double-buffered) per layer
        return (l, 0, 0)

    def amap(n, l):     # activations: one batch element, resident across layers
        return (n, 0, 0)

    def cmap(n, l):     # layer-independent params (final LayerNorm)
        return (0, 0)

    in_specs = [
        pl.BlockSpec((1, S, E), amap),                 # src
        pl.BlockSpec((1, E, 3 * E), wmap),             # wqkv (bf16)
        pl.BlockSpec((1, 1, 3 * E), wmap),             # bqkv
        pl.BlockSpec((1, E, E), wmap),                 # wo   (bf16)
        pl.BlockSpec((1, 1, E), wmap),                 # bo
        pl.BlockSpec((1, 1, E), wmap),                 # ln1g
        pl.BlockSpec((1, 1, E), wmap),                 # ln1b
        pl.BlockSpec((1, E, F), wmap),                 # w1   (bf16)
        pl.BlockSpec((1, 1, F), wmap),                 # b1
        pl.BlockSpec((1, F, E), wmap),                 # w2   (bf16)
        pl.BlockSpec((1, 1, E), wmap),                 # b2
        pl.BlockSpec((1, 1, E), wmap),                 # ln2g
        pl.BlockSpec((1, 1, E), wmap),                 # ln2b
        pl.BlockSpec((1, E), cmap),                    # lnfg
        pl.BlockSpec((1, E), cmap),                    # lnfb
    ]

    out_nse = pl.pallas_call(
        functools.partial(encoder_stack_kernel, nhead),
        out_shape=jax.ShapeDtypeStruct((N, S, E), jnp.float32),
        grid_spec=pltpu.PrefetchScalarGridSpec(
            num_scalar_prefetch=0,
            grid=(N, num_layers),                      # (parallel, arbitrary)
            in_specs=in_specs,
            out_specs=pl.BlockSpec((1, S, E), amap),
            scratch_shapes=[pltpu.VMEM((S, E), jnp.float32)]),   # layer carry
        compiler_params=pltpu.CompilerParams(
            dimension_semantics=("parallel", "arbitrary"),
            vmem_limit_bytes=32 * 1024 * 1024),
    )(src_nse,
      params['wqkv'], params['bqkv'], params['wo'], params['bo'],
      params['ln1g'], params['ln1b'],
      params['w1'], params['b1'], params['w2'], params['b2'],
      params['ln2g'], params['ln2b'],
      params['lnfg'], params['lnfb'])
    return jnp.transpose(out_nse, (1, 0, 2))


# ------------------------------ parameter init --------------------------------

def init_params(key, d_model, nhead, num_layers, dim_feedforward):
    keys = iter(jax.random.split(key, 4 * num_layers + 1))

    def xavier(shape_torch):
        # shape_torch is the PyTorch (out, in) shape; stored transposed (in, out)
        fan_out, fan_in = shape_torch
        a = math.sqrt(6.0 / (fan_in + fan_out))
        w = jax.random.uniform(next(keys), shape_torch, jnp.float32, -a, a)
        return jnp.transpose(w)

    scale = 1.0 / math.sqrt(d_model // nhead)
    stacks = {k: [] for k in
              ('wqkv', 'bqkv', 'wo', 'bo', 'ln1g', 'ln1b',
               'w1', 'b1', 'w2', 'b2', 'ln2g', 'ln2b')}
    for _ in range(num_layers):
        w_in = xavier((3 * d_model, d_model))                 # (E, 3E)
        b_in = jnp.zeros((1, 3 * d_model), jnp.float32)
        # fold 1/sqrt(head_dim) into the Q block of the fused QKV projection
        w_in = w_in.at[:, :d_model].multiply(scale)
        b_in = b_in.at[:, :d_model].multiply(scale)
        stacks['wqkv'].append(w_in.astype(jnp.bfloat16))
        stacks['bqkv'].append(b_in)
        stacks['wo'].append(xavier((d_model, d_model)).astype(jnp.bfloat16))
        stacks['bo'].append(jnp.zeros((1, d_model), jnp.float32))
        stacks['ln1g'].append(jnp.ones((1, d_model), jnp.float32))
        stacks['ln1b'].append(jnp.zeros((1, d_model), jnp.float32))
        stacks['w1'].append(xavier((dim_feedforward, d_model)).astype(jnp.bfloat16))
        stacks['b1'].append(jnp.zeros((1, dim_feedforward), jnp.float32))
        stacks['w2'].append(xavier((d_model, dim_feedforward)).astype(jnp.bfloat16))
        stacks['b2'].append(jnp.zeros((1, d_model), jnp.float32))
        stacks['ln2g'].append(jnp.ones((1, d_model), jnp.float32))
        stacks['ln2b'].append(jnp.zeros((1, d_model), jnp.float32))

    p = {k: jnp.stack(v) for k, v in stacks.items()}
    p['lnfg'] = jnp.ones((1, d_model), jnp.float32)
    p['lnfb'] = jnp.zeros((1, d_model), jnp.float32)
    return p


# ---------------------------------- main --------------------------------------

if __name__ == "__main__":
    d_model = 32
    nhead = 4
    num_encoder_layers = 2
    dim_feedforward = 64
    seq_len = 8
    batch = 2

    root = jax.random.PRNGKey(0)
    kparam, ksrc = jax.random.split(root)

    params = init_params(kparam, d_model, nhead, num_encoder_layers, dim_feedforward)
    src = jax.random.normal(ksrc, (seq_len, batch, d_model), jnp.float32)

    fwd = jax.jit(functools.partial(my_transformer_encoder_forward,
                                    nhead=nhead, num_layers=num_encoder_layers))
    out = fwd(params, src)
    out = jax.block_until_ready(out)

    assert out.shape == (seq_len, batch, d_model)
    assert bool(jnp.all(jnp.isfinite(out)))
    print("KERNEL_OK")
</pallas_src>

<mosaic_0001>
module attributes {stable_mosaic.version = 11 : i64} {
  func.func @encoder_stack_kernel(%arg0: i32, %arg1: i32, %arg2: memref<1x8x32xf32, #tpu.memory_space<vmem>>, %arg3: memref<1x32x96xbf16, #tpu.memory_space<vmem>>, %arg4: memref<1x1x96xf32, #tpu.memory_space<vmem>>, %arg5: memref<1x32x32xbf16, #tpu.memory_space<vmem>>, %arg6: memref<1x1x32xf32, #tpu.memory_space<vmem>>, %arg7: memref<1x1x32xf32, #tpu.memory_space<vmem>>, %arg8: memref<1x1x32xf32, #tpu.memory_space<vmem>>, %arg9: memref<1x32x64xbf16, #tpu.memory_space<vmem>>, %arg10: memref<1x1x64xf32, #tpu.memory_space<vmem>>, %arg11: memref<1x64x32xbf16, #tpu.memory_space<vmem>>, %arg12: memref<1x1x32xf32, #tpu.memory_space<vmem>>, %arg13: memref<1x1x32xf32, #tpu.memory_space<vmem>>, %arg14: memref<1x1x32xf32, #tpu.memory_space<vmem>>, %arg15: memref<1x32xf32, #tpu.memory_space<vmem>>, %arg16: memref<1x32xf32, #tpu.memory_space<vmem>>, %arg17: memref<1x8x32xf32, #tpu.memory_space<vmem>>, %arg18: memref<8x32xf32, #tpu.memory_space<vmem>>) attributes {dimension_semantics = [#tpu.dimension_semantics<parallel>, #tpu.dimension_semantics<arbitrary>], iteration_bounds = array<i64: 2, 2>, scalar_prefetch = 0 : i64, scratch_operands = 1 : i64, tpu.core_type = #tpu.core_type<tc>, window_params = [{transform_indices = @transform_0, window_bounds = array<i64: 1, 8, 32>}, {transform_indices = @transform_1, window_bounds = array<i64: 1, 32, 96>}, {transform_indices = @transform_2, window_bounds = array<i64: 1, 1, 96>}, {transform_indices = @transform_3, window_bounds = array<i64: 1, 32, 32>}, {transform_indices = @transform_4, window_bounds = array<i64: 1, 1, 32>}, {transform_indices = @transform_5, window_bounds = array<i64: 1, 1, 32>}, {transform_indices = @transform_6, window_bounds = array<i64: 1, 1, 32>}, {transform_indices = @transform_7, window_bounds = array<i64: 1, 32, 64>}, {transform_indices = @transform_8, window_bounds = array<i64: 1, 1, 64>}, {transform_indices = @transform_9, window_bounds = array<i64: 1, 64, 32>}, {transform_indices = @transform_10, window_bounds = array<i64: 1, 1, 32>}, {transform_indices = @transform_11, window_bounds = array<i64: 1, 1, 32>}, {transform_indices = @transform_12, window_bounds = array<i64: 1, 1, 32>}, {pipeline_mode = #tpu.pipeline_mode<synchronous>, transform_indices = @transform_13, window_bounds = array<i64: 1, 32>}, {pipeline_mode = #tpu.pipeline_mode<synchronous>, transform_indices = @transform_14, window_bounds = array<i64: 1, 32>}, {transform_indices = @transform_15, window_bounds = array<i64: 1, 8, 32>}]} {
    %c0_i32 = arith.constant 0 : i32
    %0 = arith.cmpi eq, %arg1, %c0_i32 : i32
    %1 = arith.extui %0 : i1 to i32
    %c0_i32_0 = arith.constant 0 : i32
    %2 = arith.cmpi ne, %1, %c0_i32_0 : i32
    scf.if %2 {
      %c0_59 = arith.constant 0 : index
      %c0_60 = arith.constant 0 : index
      %c0_61 = arith.constant 0 : index
      %147 = vector.load %arg2[%c0_59, %c0_60, %c0_61] : memref<1x8x32xf32, #tpu.memory_space<vmem>>, vector<1x8x32xf32>
      %148 = vector.shape_cast %147 : vector<1x8x32xf32> to vector<8x32xf32>
      %c0_62 = arith.constant 0 : index
      %c0_63 = arith.constant 0 : index
      %149 = vector.load %arg18[%c0_62, %c0_63] : memref<8x32xf32, #tpu.memory_space<vmem>>, vector<8x32xf32>
      tpu.vector_store %arg18[%c0_62, %c0_63], %148 {strides = array<i32>} : memref<8x32xf32, #tpu.memory_space<vmem>>, vector<8x32xf32>,
    } else {
    }
    %c0 = arith.constant 0 : index
    %c0_1 = arith.constant 0 : index
    %3 = vector.load %arg18[%c0, %c0_1] : memref<8x32xf32, #tpu.memory_space<vmem>>, vector<8x32xf32>
    %4 = arith.truncf %3 : vector<8x32xf32> to vector<8x32xbf16>
    %c0_2 = arith.constant 0 : index
    %c0_3 = arith.constant 0 : index
    %c0_4 = arith.constant 0 : index
    %5 = vector.load %arg3[%c0_2, %c0_3, %c0_4] : memref<1x32x96xbf16, #tpu.memory_space<vmem>>, vector<1x32x96xbf16>
    %6 = vector.shape_cast %5 : vector<1x32x96xbf16> to vector<32x96xbf16>
    %cst = arith.constant dense<0.000000e+00> : vector<8x96xf32>
    %7 = tpu.matmul %4, %6, %cst {dimension_numbers = #tpu.dot_dimension_numbers<[1], [0], [0], [1], [0, 0, 1, 1], [], []>} : vector<8x32xbf16>, vector<32x96xbf16>, vector<8x96xf32> -> vector<8x96xf32>
    %c0_5 = arith.constant 0 : index
    %c0_6 = arith.constant 0 : index
    %c0_7 = arith.constant 0 : index
    %8 = vector.load %arg4[%c0_5, %c0_6, %c0_7] : memref<1x1x96xf32, #tpu.memory_space<vmem>>, vector<1x1x96xf32>
    %9 = vector.shape_cast %8 : vector<1x1x96xf32> to vector<1x96xf32>
    %10 = vector.broadcast %9 : vector<1x96xf32> to vector<8x96xf32>
    %11 = arith.addf %7, %10 : vector<8x96xf32>
    %12 = vector.extract_strided_slice %11 {offsets = [0, 0], sizes = [8, 32], strides = [1, 1]} : vector<8x96xf32> to vector<8x32xf32>
    %13 = vector.extract_strided_slice %12 {offsets = [0, 0], sizes = [8, 8], strides = [1, 1]} : vector<8x32xf32> to vector<8x8xf32>
    %14 = vector.extract_strided_slice %12 {offsets = [0, 8], sizes = [8, 8], strides = [1, 1]} : vector<8x32xf32> to vector<8x8xf32>
    %15 = vector.extract_strided_slice %12 {offsets = [0, 16], sizes = [8, 8], strides = [1, 1]} : vector<8x32xf32> to vector<8x8xf32>
    %16 = vector.extract_strided_slice %12 {offsets = [0, 24], sizes = [8, 8], strides = [1, 1]} : vector<8x32xf32> to vector<8x8xf32>
    %17 = vector.shape_cast %13 : vector<8x8xf32> to vector<1x8x8xf32>
    %18 = vector.shape_cast %14 : vector<8x8xf32> to vector<1x8x8xf32>
    %19 = vector.shape_cast %15 : vector<8x8xf32> to vector<1x8x8xf32>
    %20 = vector.shape_cast %16 : vector<8x8xf32> to vector<1x8x8xf32>
    %21 = tpu.concatenate %17, %18, %19, %20 in 0 : vector<1x8x8xf32>, vector<1x8x8xf32>, vector<1x8x8xf32>, vector<1x8x8xf32> -> vector<4x8x8xf32>
    %22 = arith.truncf %21 : vector<4x8x8xf32> to vector<4x8x8xbf16>
    %23 = vector.extract_strided_slice %11 {offsets = [0, 32], sizes = [8, 32], strides = [1, 1]} : vector<8x96xf32> to vector<8x32xf32>
    %24 = vector.extract_strided_slice %23 {offsets = [0, 0], sizes = [8, 8], strides = [1, 1]} : vector<8x32xf32> to vector<8x8xf32>
    %25 = vector.extract_strided_slice %23 {offsets = [0, 8], sizes = [8, 8], strides = [1, 1]} : vector<8x32xf32> to vector<8x8xf32>
    %26 = vector.extract_strided_slice %23 {offsets = [0, 16], sizes = [8, 8], strides = [1, 1]} : vector<8x32xf32> to vector<8x8xf32>
    %27 = vector.extract_strided_slice %23 {offsets = [0, 24], sizes = [8, 8], strides = [1, 1]} : vector<8x32xf32> to vector<8x8xf32>
    %28 = vector.shape_cast %24 : vector<8x8xf32> to vector<1x8x8xf32>
    %29 = vector.shape_cast %25 : vector<8x8xf32> to vector<1x8x8xf32>
    %30 = vector.shape_cast %26 : vector<8x8xf32> to vector<1x8x8xf32>
    %31 = vector.shape_cast %27 : vector<8x8xf32> to vector<1x8x8xf32>
    %32 = tpu.concatenate %28, %29, %30, %31 in 0 : vector<1x8x8xf32>, vector<1x8x8xf32>, vector<1x8x8xf32>, vector<1x8x8xf32> -> vector<4x8x8xf32>
    %33 = arith.truncf %32 : vector<4x8x8xf32> to vector<4x8x8xbf16>
    %34 = vector.extract_strided_slice %11 {offsets = [0, 64], sizes = [8, 32], strides = [1, 1]} : vector<8x96xf32> to vector<8x32xf32>
    %35 = vector.extract_strided_slice %34 {offsets = [0, 0], sizes = [8, 8], strides = [1, 1]} : vector<8x32xf32> to vector<8x8xf32>
    %36 = vector.extract_strided_slice %34 {offsets = [0, 8], sizes = [8, 8], strides = [1, 1]} : vector<8x32xf32> to vector<8x8xf32>
    %37 = vector.extract_strided_slice %34 {offsets = [0, 16], sizes = [8, 8], strides = [1, 1]} : vector<8x32xf32> to vector<8x8xf32>
    %38 = vector.extract_strided_slice %34 {offsets = [0, 24], sizes = [8, 8], strides = [1, 1]} : vector<8x32xf32> to vector<8x8xf32>
    %39 = vector.shape_cast %35 : vector<8x8xf32> to vector<1x8x8xf32>
    %40 = vector.shape_cast %36 : vector<8x8xf32> to vector<1x8x8xf32>
    %41 = vector.shape_cast %37 : vector<8x8xf32> to vector<1x8x8xf32>
    %42 = vector.shape_cast %38 : vector<8x8xf32> to vector<1x8x8xf32>
    %43 = tpu.concatenate %39, %40, %41, %42 in 0 : vector<1x8x8xf32>, vector<1x8x8xf32>, vector<1x8x8xf32>, vector<1x8x8xf32> -> vector<4x8x8xf32>
    %44 = arith.truncf %43 : vector<4x8x8xf32> to vector<4x8x8xbf16>
    "tpu.trace_start"() <{level = 10 : i32, message = "hqd,hkd->hqk"}> : () -> ()
    %cst_8 = arith.constant dense<0.000000e+00> : vector<4x8x8xf32>
    %45 = tpu.matmul %22, %33, %cst_8 {dimension_numbers = #tpu.dot_dimension_numbers<[2], [2], [1], [1], [0, 0, 0, 1, 1, 1], [0], [0]>} : vector<4x8x8xbf16>, vector<4x8x8xbf16>, vector<4x8x8xf32> -> vector<4x8x8xf32>
    "tpu.trace_stop"() : () -> ()
    %cst_9 = arith.constant dense<0xFF800000> : vector<4x8xf32>
    %46 = vector.multi_reduction <maximumf>, %45, %cst_9 [2] : vector<4x8x8xf32> to vector<4x8xf32>
    %47 = vector.shape_cast %46 : vector<4x8xf32> to vector<4x8x1xf32>
    %48 = vector.broadcast %47 : vector<4x8x1xf32> to vector<4x8x8xf32>
    %49 = arith.subf %45, %48 : vector<4x8x8xf32>
    %50 = math.exp %49 : vector<4x8x8xf32>
    %cst_10 = arith.constant dense<0.000000e+00> : vector<4x8xf32>
    %51 = vector.multi_reduction <add>, %50, %cst_10 [2] : vector<4x8x8xf32> to vector<4x8xf32>
    %52 = vector.shape_cast %51 : vector<4x8xf32> to vector<4x8x1xf32>
    %53 = tpu.reciprocal %52 {approx = true} : vector<4x8x1xf32> -> vector<4x8x1xf32>
    %54 = vector.broadcast %53 : vector<4x8x1xf32> to vector<4x8x8xf32>
    %55 = arith.mulf %50, %54 : vector<4x8x8xf32>
    %56 = arith.truncf %55 : vector<4x8x8xf32> to vector<4x8x8xbf16>
    "tpu.trace_start"() <{level = 10 : i32, message = "hqk,hkd->hqd"}> : () -> ()
    %cst_11 = arith.constant dense<0.000000e+00> : vector<4x8x8xf32>
    %57 = tpu.matmul %56, %44, %cst_11 {dimension_numbers = #tpu.dot_dimension_numbers<[2], [1], [1], [2], [0, 0, 0, 1, 1, 2], [0], [0]>} : vector<4x8x8xbf16>, vector<4x8x8xbf16>, vector<4x8x8xf32> -> vector<4x8x8xf32>
    "tpu.trace_stop"() : () -> ()
    %58 = vector.extract_strided_slice %57 {offsets = [0, 0, 0], sizes = [1, 8, 8], strides = [1, 1, 1]} : vector<4x8x8xf32> to vector<1x8x8xf32>
    %59 = vector.shape_cast %58 : vector<1x8x8xf32> to vector<8x8xf32>
    %60 = vector.extract_strided_slice %57 {offsets = [1, 0, 0], sizes = [1, 8, 8], strides = [1, 1, 1]} : vector<4x8x8xf32> to vector<1x8x8xf32>
    %61 = vector.shape_cast %60 : vector<1x8x8xf32> to vector<8x8xf32>
    %62 = vector.extract_strided_slice %57 {offsets = [2, 0, 0], sizes = [1, 8, 8], strides = [1, 1, 1]} : vector<4x8x8xf32> to vector<1x8x8xf32>
    %63 = vector.shape_cast %62 : vector<1x8x8xf32> to vector<8x8xf32>
    %64 = vector.extract_strided_slice %57 {offsets = [3, 0, 0], sizes = [1, 8, 8], strides = [1, 1, 1]} : vector<4x8x8xf32> to vector<1x8x8xf32>
    %65 = vector.shape_cast %64 : vector<1x8x8xf32> to vector<8x8xf32>
    %66 = tpu.concatenate %59, %61, %63, %65 in 1 : vector<8x8xf32>, vector<8x8xf32>, vector<8x8xf32>, vector<8x8xf32> -> vector<8x32xf32>
    %67 = arith.truncf %66 : vector<8x32xf32> to vector<8x32xbf16>
    %c0_12 = arith.constant 0 : index
    %c0_13 = arith.constant 0 : index
    %c0_14 = arith.constant 0 : index
    %68 = vector.load %arg5[%c0_12, %c0_13, %c0_14] : memref<1x32x32xbf16, #tpu.memory_space<vmem>>, vector<1x32x32xbf16>
    %69 = vector.shape_cast %68 : vector<1x32x32xbf16> to vector<32x32xbf16>
    %cst_15 = arith.constant dense<0.000000e+00> : vector<8x32xf32>
    %70 = tpu.matmul %67, %69, %cst_15 {dimension_numbers = #tpu.dot_dimension_numbers<[1], [0], [0], [1], [0, 0, 1, 1], [], []>} : vector<8x32xbf16>, vector<32x32xbf16>, vector<8x32xf32> -> vector<8x32xf32>
    %c0_16 = arith.constant 0 : index
    %c0_17 = arith.constant 0 : index
    %c0_18 = arith.constant 0 : index
    %71 = vector.load %arg6[%c0_16, %c0_17, %c0_18] : memref<1x1x32xf32, #tpu.memory_space<vmem>>, vector<1x1x32xf32>
    %72 = vector.shape_cast %71 : vector<1x1x32xf32> to vector<1x32xf32>
    %73 = vector.broadcast %72 : vector<1x32xf32> to vector<8x32xf32>
    %74 = arith.addf %70, %73 : vector<8x32xf32>
    %75 = arith.addf %3, %74 : vector<8x32xf32>
    %c0_19 = arith.constant 0 : index
    %c0_20 = arith.constant 0 : index
    %c0_21 = arith.constant 0 : index
    %76 = vector.load %arg7[%c0_19, %c0_20, %c0_21] : memref<1x1x32xf32, #tpu.memory_space<vmem>>, vector<1x1x32xf32>
    %77 = vector.shape_cast %76 : vector<1x1x32xf32> to vector<1x32xf32>
    %c0_22 = arith.constant 0 : index
    %c0_23 = arith.constant 0 : index
    %c0_24 = arith.constant 0 : index
    %78 = vector.load %arg8[%c0_22, %c0_23, %c0_24] : memref<1x1x32xf32, #tpu.memory_space<vmem>>, vector<1x1x32xf32>
    %79 = vector.shape_cast %78 : vector<1x1x32xf32> to vector<1x32xf32>
    %cst_25 = arith.constant dense<0.000000e+00> : vector<8xf32>
    %80 = vector.multi_reduction <add>, %75, %cst_25 [1] : vector<8x32xf32> to vector<8xf32>
    %81 = vector.shape_cast %80 : vector<8xf32> to vector<8x1xf32>
    %cst_26 = arith.constant 3.200000e+01 : f32
    %82 = vector.broadcast %cst_26 : f32 to vector<8x1xf32>
    %83 = arith.divf %81, %82 : vector<8x1xf32>
    %84 = vector.broadcast %83 : vector<8x1xf32> to vector<8x32xf32>
    %85 = arith.subf %75, %84 : vector<8x32xf32>
    %86 = arith.mulf %85, %85 : vector<8x32xf32>
    %cst_27 = arith.constant dense<0.000000e+00> : vector<8xf32>
    %87 = vector.multi_reduction <add>, %86, %cst_27 [1] : vector<8x32xf32> to vector<8xf32>
    %88 = vector.shape_cast %87 : vector<8xf32> to vector<8x1xf32>
    %cst_28 = arith.constant 3.200000e+01 : f32
    %89 = vector.broadcast %cst_28 : f32 to vector<8x1xf32>
    %90 = arith.divf %88, %89 : vector<8x1xf32>
    %cst_29 = arith.constant 9.99999974E-6 : f32
    %91 = vector.broadcast %cst_29 : f32 to vector<8x1xf32>
    %92 = arith.addf %90, %91 : vector<8x1xf32>
    %93 = math.rsqrt %92 : vector<8x1xf32>
    %94 = vector.broadcast %93 : vector<8x1xf32> to vector<8x32xf32>
    %95 = arith.mulf %85, %94 : vector<8x32xf32>
    %96 = vector.broadcast %77 : vector<1x32xf32> to vector<8x32xf32>
    %97 = arith.mulf %95, %96 : vector<8x32xf32>
    %98 = vector.broadcast %79 : vector<1x32xf32> to vector<8x32xf32>
    %99 = arith.addf %97, %98 : vector<8x32xf32>
    %100 = arith.truncf %99 : vector<8x32xf32> to vector<8x32xbf16>
    %c0_30 = arith.constant 0 : index
    %c0_31 = arith.constant 0 : index
    %c0_32 = arith.constant 0 : index
    %101 = vector.load %arg9[%c0_30, %c0_31, %c0_32] : memref<1x32x64xbf16, #tpu.memory_space<vmem>>, vector<1x32x64xbf16>
    %102 = vector.shape_cast %101 : vector<1x32x64xbf16> to vector<32x64xbf16>
    %cst_33 = arith.constant dense<0.000000e+00> : vector<8x64xf32>
    %103 = tpu.matmul %100, %102, %cst_33 {dimension_numbers = #tpu.dot_dimension_numbers<[1], [0], [0], [1], [0, 0, 1, 1], [], []>} : vector<8x32xbf16>, vector<32x64xbf16>, vector<8x64xf32> -> vector<8x64xf32>
    %c0_34 = arith.constant 0 : index
    %c0_35 = arith.constant 0 : index
    %c0_36 = arith.constant 0 : index
    %104 = vector.load %arg10[%c0_34, %c0_35, %c0_36] : memref<1x1x64xf32, #tpu.memory_space<vmem>>, vector<1x1x64xf32>
    %105 = vector.shape_cast %104 : vector<1x1x64xf32> to vector<1x64xf32>
    %106 = vector.broadcast %105 : vector<1x64xf32> to vector<8x64xf32>
    %107 = arith.addf %103, %106 : vector<8x64xf32>
    %cst_37 = arith.constant 0.000000e+00 : f32
    %108 = vector.broadcast %cst_37 : f32 to vector<8x64xf32>
    %109 = arith.maximumf %107, %108 : vector<8x64xf32>
    %110 = arith.truncf %109 : vector<8x64xf32> to vector<8x64xbf16>
    %c0_38 = arith.constant 0 : index
    %c0_39 = arith.constant 0 : index
    %c0_40 = arith.constant 0 : index
    %111 = vector.load %arg11[%c0_38, %c0_39, %c0_40] : memref<1x64x32xbf16, #tpu.memory_space<vmem>>, vector<1x64x32xbf16>
    %112 = vector.shape_cast %111 : vector<1x64x32xbf16> to vector<64x32xbf16>
    %cst_41 = arith.constant dense<0.000000e+00> : vector<8x32xf32>
    %113 = tpu.matmul %110, %112, %cst_41 {dimension_numbers = #tpu.dot_dimension_numbers<[1], [0], [0], [1], [0, 0, 1, 1], [], []>} : vector<8x64xbf16>, vector<64x32xbf16>, vector<8x32xf32> -> vector<8x32xf32>
    %c0_42 = arith.constant 0 : index
    %c0_43 = arith.constant 0 : index
    %c0_44 = arith.constant 0 : index
    %114 = vector.load %arg12[%c0_42, %c0_43, %c0_44] : memref<1x1x32xf32, #tpu.memory_space<vmem>>, vector<1x1x32xf32>
    %115 = vector.shape_cast %114 : vector<1x1x32xf32> to vector<1x32xf32>
    %116 = vector.broadcast %115 : vector<1x32xf32> to vector<8x32xf32>
    %117 = arith.addf %113, %116 : vector<8x32xf32>
    %118 = arith.addf %99, %117 : vector<8x32xf32>
    %c0_45 = arith.constant 0 : index
    %c0_46 = arith.constant 0 : index
    %c0_47 = arith.constant 0 : index
    %119 = vector.load %arg13[%c0_45, %c0_46, %c0_47] : memref<1x1x32xf32, #tpu.memory_space<vmem>>, vector<1x1x32xf32>
    %120 = vector.shape_cast %119 : vector<1x1x32xf32> to vector<1x32xf32>
    %c0_48 = arith.constant 0 : index
    %c0_49 = arith.constant 0 : index
    %c0_50 = arith.constant 0 : index
    %121 = vector.load %arg14[%c0_48, %c0_49, %c0_50] : memref<1x1x32xf32, #tpu.memory_space<vmem>>, vector<1x1x32xf32>
    %122 = vector.shape_cast %121 : vector<1x1x32xf32> to vector<1x32xf32>
    %cst_51 = arith.constant dense<0.000000e+00> : vector<8xf32>
    %123 = vector.multi_reduction <add>, %118, %cst_51 [1] : vector<8x32xf32> to vector<8xf32>
    %124 = vector.shape_cast %123 : vector<8xf32> to vector<8x1xf32>
    %cst_52 = arith.constant 3.200000e+01 : f32
    %125 = vector.broadcast %cst_52 : f32 to vector<8x1xf32>
    %126 = arith.divf %124, %125 : vector<8x1xf32>
    %127 = vector.broadcast %126 : vector<8x1xf32> to vector<8x32xf32>
    %128 = arith.subf %118, %127 : vector<8x32xf32>
    %129 = arith.mulf %128, %128 : vector<8x32xf32>
    %cst_53 = arith.constant dense<0.000000e+00> : vector<8xf32>
    %130 = vector.multi_reduction <add>, %129, %cst_53 [1] : vector<8x32xf32> to vector<8xf32>
    %131 = vector.shape_cast %130 : vector<8xf32> to vector<8x1xf32>
    %cst_54 = arith.constant 3.200000e+01 : f32
    %132 = vector.broadcast %cst_54 : f32 to vector<8x1xf32>
    %133 = arith.divf %131, %132 : vector<8x1xf32>
    %cst_55 = arith.constant 9.99999974E-6 : f32
    %134 = vector.broadcast %cst_55 : f32 to vector<8x1xf32>
    %135 = arith.addf %133, %134 : vector<8x1xf32>
    %136 = math.rsqrt %135 : vector<8x1xf32>
    %137 = vector.broadcast %136 : vector<8x1xf32> to vector<8x32xf32>
    %138 = arith.mulf %128, %137 : vector<8x32xf32>
    %139 = vector.broadcast %120 : vector<1x32xf32> to vector<8x32xf32>
    %140 = arith.mulf %138, %139 : vector<8x32xf32>
    %141 = vector.broadcast %122 : vector<1x32xf32> to vector<8x32xf32>
    %142 = arith.addf %140, %141 : vector<8x32xf32>
    %c0_56 = arith.constant 0 : index
    %c0_57 = arith.constant 0 : index
    %143 = vector.load %arg18[%c0_56, %c0_57] : memref<8x32xf32, #tpu.memory_space<vmem>>, vector<8x32xf32>
    tpu.vector_store %arg18[%c0_56, %c0_57], %142 {strides = array<i32>} : memref<8x32xf32, #tpu.memory_space<vmem>>, vector<8x32xf32>,
    %c1_i32 = arith.constant 1 : i32
    %144 = arith.cmpi eq, %arg1, %c1_i32 : i32
    %145 = arith.extui %144 : i1 to i32
    %c0_i32_58 = arith.constant 0 : i32
    %146 = arith.cmpi ne, %145, %c0_i32_58 : i32
    scf.if %146 {
      %c0_59 = arith.constant 0 : index
      %c0_60 = arith.constant 0 : index
      %147 = vector.load %arg15[%c0_59, %c0_60] : memref<1x32xf32, #tpu.memory_space<vmem>>, vector<1x32xf32>
      %c0_61 = arith.constant 0 : index
      %c0_62 = arith.constant 0 : index
      %148 = vector.load %arg16[%c0_61, %c0_62] : memref<1x32xf32, #tpu.memory_space<vmem>>, vector<1x32xf32>
      %cst_63 = arith.constant dense<0.000000e+00> : vector<8xf32>
      %149 = vector.multi_reduction <add>, %142, %cst_63 [1] : vector<8x32xf32> to vector<8xf32>
      %150 = vector.shape_cast %149 : vector<8xf32> to vector<8x1xf32>
      %cst_64 = arith.constant 3.200000e+01 : f32
      %151 = vector.broadcast %cst_64 : f32 to vector<8x1xf32>
      %152 = arith.divf %150, %151 : vector<8x1xf32>
      %153 = vector.broadcast %152 : vector<8x1xf32> to vector<8x32xf32>
      %154 = arith.subf %142, %153 : vector<8x32xf32>
      %155 = arith.mulf %154, %154 : vector<8x32xf32>
      %cst_65 = arith.constant dense<0.000000e+00> : vector<8xf32>
      %156 = vector.multi_reduction <add>, %155, %cst_65 [1] : vector<8x32xf32> to vector<8xf32>
      %157 = vector.shape_cast %156 : vector<8xf32> to vector<8x1xf32>
      %cst_66 = arith.constant 3.200000e+01 : f32
      %158 = vector.broadcast %cst_66 : f32 to vector<8x1xf32>
      %159 = arith.divf %157, %158 : vector<8x1xf32>
      %cst_67 = arith.constant 9.99999974E-6 : f32
      %160 = vector.broadcast %cst_67 : f32 to vector<8x1xf32>
      %161 = arith.addf %159, %160 : vector<8x1xf32>
      %162 = math.rsqrt %161 : vector<8x1xf32>
      %163 = vector.broadcast %162 : vector<8x1xf32> to vector<8x32xf32>
      %164 = arith.mulf %154, %163 : vector<8x32xf32>
      %165 = vector.broadcast %147 : vector<1x32xf32> to vector<8x32xf32>
      %166 = arith.mulf %164, %165 : vector<8x32xf32>
      %167 = vector.broadcast %148 : vector<1x32xf32> to vector<8x32xf32>
      %168 = arith.addf %166, %167 : vector<8x32xf32>
      %c0_68 = arith.constant 0 : index
      %c0_69 = arith.constant 0 : index
      %c0_70 = arith.constant 0 : index
      %169 = vector.load %arg17[%c0_68, %c0_69, %c0_70] : memref<1x8x32xf32, #tpu.memory_space<vmem>>, vector<1x8x32xf32>
      %170 = vector.shape_cast %169 : vector<1x8x32xf32> to vector<8x32xf32>
      %171 = vector.shape_cast %168 : vector<8x32xf32> to vector<1x8x32xf32>
      tpu.vector_store %arg17[%c0_68, %c0_69, %c0_70], %171 {strides = array<i32>} : memref<1x8x32xf32, #tpu.memory_space<vmem>>, vector<1x8x32xf32>,
    } else {
    }
    return
  }
  func.func @transform_0(%arg0: i32, %arg1: i32) -> (i32, i32, i32) {
    %c0_i32 = arith.constant 0 : i32
    %c0_i32_0 = arith.constant 0 : i32
    %c0_i32_1 = arith.constant 0 : i32
    return %arg0, %c0_i32, %c0_i32_0 : i32, i32, i32
  }
  func.func @transform_1(%arg0: i32, %arg1: i32) -> (i32, i32, i32) {
    %c0_i32 = arith.constant 0 : i32
    %c0_i32_0 = arith.constant 0 : i32
    %c0_i32_1 = arith.constant 0 : i32
    return %arg1, %c0_i32, %c0_i32_0 : i32, i32, i32
  }
  func.func @transform_2(%arg0: i32, %arg1: i32) -> (i32, i32, i32) {
    %c0_i32 = arith.constant 0 : i32
    %c0_i32_0 = arith.constant 0 : i32
    %c0_i32_1 = arith.constant 0 : i32
    return %arg1, %c0_i32, %c0_i32_0 : i32, i32, i32
  }
  func.func @transform_3(%arg0: i32, %arg1: i32) -> (i32, i32, i32) {
    %c0_i32 = arith.constant 0 : i32
    %c0_i32_0 = arith.constant 0 : i32
    %c0_i32_1 = arith.constant 0 : i32
    return %arg1, %c0_i32, %c0_i32_0 : i32, i32, i32
  }
  func.func @transform_4(%arg0: i32, %arg1: i32) -> (i32, i32, i32) {
    %c0_i32 = arith.constant 0 : i32
    %c0_i32_0 = arith.constant 0 : i32
    %c0_i32_1 = arith.constant 0 : i32
    return %arg1, %c0_i32, %c0_i32_0 : i32, i32, i32
  }
  func.func @transform_5(%arg0: i32, %arg1: i32) -> (i32, i32, i32) {
    %c0_i32 = arith.constant 0 : i32
    %c0_i32_0 = arith.constant 0 : i32
    %c0_i32_1 = arith.constant 0 : i32
    return %arg1, %c0_i32, %c0_i32_0 : i32, i32, i32
  }
  func.func @transform_6(%arg0: i32, %arg1: i32) -> (i32, i32, i32) {
    %c0_i32 = arith.constant 0 : i32
    %c0_i32_0 = arith.constant 0 : i32
    %c0_i32_1 = arith.constant 0 : i32
    return %arg1, %c0_i32, %c0_i32_0 : i32, i32, i32
  }
  func.func @transform_7(%arg0: i32, %arg1: i32) -> (i32, i32, i32) {
    %c0_i32 = arith.constant 0 : i32
    %c0_i32_0 = arith.constant 0 : i32
    %c0_i32_1 = arith.constant 0 : i32
    return %arg1, %c0_i32, %c0_i32_0 : i32, i32, i32
  }
  func.func @transform_8(%arg0: i32, %arg1: i32) -> (i32, i32, i32) {
    %c0_i32 = arith.constant 0 : i32
    %c0_i32_0 = arith.constant 0 : i32
    %c0_i32_1 = arith.constant 0 : i32
    return %arg1, %c0_i32, %c0_i32_0 : i32, i32, i32
  }
  func.func @transform_9(%arg0: i32, %arg1: i32) -> (i32, i32, i32) {
    %c0_i32 = arith.constant 0 : i32
    %c0_i32_0 = arith.constant 0 : i32
    %c0_i32_1 = arith.constant 0 : i32
    return %arg1, %c0_i32, %c0_i32_0 : i32, i32, i32
  }
  func.func @transform_10(%arg0: i32, %arg1: i32) -> (i32, i32, i32) {
    %c0_i32 = arith.constant 0 : i32
    %c0_i32_0 = arith.constant 0 : i32
    %c0_i32_1 = arith.constant 0 : i32
    return %arg1, %c0_i32, %c0_i32_0 : i32, i32, i32
  }
  func.func @transform_11(%arg0: i32, %arg1: i32) -> (i32, i32, i32) {
    %c0_i32 = arith.constant 0 : i32
    %c0_i32_0 = arith.constant 0 : i32
    %c0_i32_1 = arith.constant 0 : i32
    return %arg1, %c0_i32, %c0_i32_0 : i32, i32, i32
  }
  func.func @transform_12(%arg0: i32, %arg1: i32) -> (i32, i32, i32) {
    %c0_i32 = arith.constant 0 : i32
    %c0_i32_0 = arith.constant 0 : i32
    %c0_i32_1 = arith.constant 0 : i32
    return %arg1, %c0_i32, %c0_i32_0 : i32, i32, i32
  }
  func.func @transform_13(%arg0: i32, %arg1: i32) -> (i32, i32) {
    %c0_i32 = arith.constant 0 : i32
    %c0_i32_0 = arith.constant 0 : i32
    %c0_i32_1 = arith.constant 0 : i32
    return %c0_i32, %c0_i32_0 : i32, i32
  }
  func.func @transform_14(%arg0: i32, %arg1: i32) -> (i32, i32) {
    %c0_i32 = arith.constant 0 : i32
    %c0_i32_0 = arith.constant 0 : i32
    %c0_i32_1 = arith.constant 0 : i32
    return %c0_i32, %c0_i32_0 : i32, i32
  }
  func.func @transform_15(%arg0: i32, %arg1: i32) -> (i32, i32, i32) {
    %c0_i32 = arith.constant 0 : i32
    %c0_i32_0 = arith.constant 0 : i32
    %c0_i32_1 = arith.constant 0 : i32
    return %arg0, %c0_i32, %c0_i32_0 : i32, i32, i32
  }
}

</mosaic_0001>

<bundles_post_ra>
// kernel: my_transformer_encoder_forward.1
= control target key start
LH: loop header
LB: loop body
LE: loop exit
PB: predicated region body
PF: predicated region fallthrough
CT: control target
= control target key end

     0   :  { %s2120_s18 = smov 0   ;;  %s2122_s19 = smov 0   ;;  %s2390_s0 = inlined_call_operand.vmem [shape: f32[2,8,32], index: 0, kind: input, shape index: {}]   ;;  %s2391_s1 = inlined_call_operand.vmem [shape: bf16[2,32,96], index: 1, kind: input, shape index: {}]   ;;  %s2392_s2 = inlined_call_operand.vmem [shape: f32[2,1,96], index: 2, kind: input, shape index: {}]   ;;  %s2393_s3 = inlined_call_operand.vmem [shape: bf16[2,32,32], index: 3, kind: input, shape index: {}]   ;;  %s2394_s4 = inlined_call_operand.vmem [shape: f32[2,1,32], index: 4, kind: input, shape index: {}]   ;;  %s2395_s5 = inlined_call_operand.vmem [shape: f32[2,1,32], index: 5, kind: input, shape index: {}]   ;;  %s2396_s6 = inlined_call_operand.vmem [shape: f32[2,1,32], index: 6, kind: input, shape index: {}]   ;;  %s2397_s7 = inlined_call_operand.vmem [shape: bf16[2,32,64], index: 7, kind: input, shape index: {}]   ;;  %s2398_s8 = inlined_call_operand.vmem [shape: f32[2,1,64], index: 8, kind: input, shape index: {}]   ;;  %s2399_s9 = inlined_call_operand.vmem [shape: bf16[2,64,32], index: 9, kind: input, shape index: {}]   ;;  %s2400_s10 = inlined_call_operand.vmem [shape: f32[2,1,32], index: 10, kind: input, shape index: {}]   ;;  %s2401_s11 = inlined_call_operand.vmem [shape: f32[2,1,32], index: 11, kind: input, shape index: {}]   ;;  %s2402_s12 = inlined_call_operand.vmem [shape: f32[2,1,32], index: 12, kind: input, shape index: {}]   ;;  %s2403_s13 = inlined_call_operand.vmem [shape: f32[1,32], index: 13, kind: input, shape index: {}]   ;;  %s2404_s14 = inlined_call_operand.vmem [shape: f32[1,32], index: 14, kind: input, shape index: {}]   ;;  %s2405_s15 = inlined_call_operand.vmem [shape: f32[2,8,32], index: 15, kind: output, shape index: {}]  }
   0x1   :  { %2410 = sst [smem:[#allocation9_spill]] %s2390_s0  ;;  %s2124_s20 = smov 0  }
   0x2   :  { %2411 = sst [smem:[#allocation10_spill]] %s2391_s1  ;;  %s2126_s21 = smov 0  }
   0x3   :  { %2412 = sst [smem:[#allocation11_spill]] %s2393_s3  ;;  %s2128_s22 = smov 0  }
   0x4   :  { %2413 = sst [smem:[#allocation12_spill]] %s2397_s7 }
   0x5   :  { %2414 = sst [smem:[#allocation13_spill]] %s2398_s8 }
   0x6   :  { %2415 = sst [smem:[#allocation14_spill]] %s2402_s12 }
   0x7   :  { %2416 = sst [smem:[#allocation15_spill]] %s2403_s13 }
   0x8   :  { %2417 = sst [smem:[#allocation16_spill]] %s2404_s14 }
   0x9   :  { %2418 = sst [smem:[#allocation17_spill]] %s2405_s15 }
   0xa LB: > { %2419 = sst [smem:[#allocation3_spill]] %s2012_s18  ;;  %s34_s23 = sadd.s32 1, %s2020_s20  ;;  %s2028_s22 = sphi %s2128_s22, %s25_s22   ;;  %s2024_s21 = sphi %s2126_s21, %s2447_s21   ;;  %s2020_s20 = sphi %s2124_s20, %s2446_s20   ;;  %s2016_s19 = sphi %s2122_s19, %s2445_s19   ;;  %s2012_s18 = sphi %s2120_s18, %s2444_s18  }
   0xb   : > { %2420 = sst [smem:[#allocation4_spill]] %s2020_s20  ;;  %s37_s24 = sadd.s32 1, %s2024_s21 }
   0xc   : > { %2421 = sst [smem:[#allocation5_spill]] %s2024_s21  ;;  %p35_p0 = scmp.ge.s32.totalorder %s34_s23, 2 }
   0xd   : > { %2422 = sst [smem:[#allocation6_spill]] %s2028_s22  ;;  %p1743_p1 = scmp.ge.s32.totalorder %s2028_s22, 1 }
   0xe   : > { %p552_p2 = scmp.lt.s32.totalorder %s2028_s22, 5  ;;  %s2449_s23 = smov (%p35_p0, %s34_s23), 0 }
   0xf   : > { %2423 = sst [smem:[#allocation7_spill]] %s2449_s23  ;;  %s2451_s24 = smov (!%p35_p0, %s37_s24), %s2024_s21 }
  0x10   : > { %p553_p3 = pnand %p1743_p1, %p552_p2  ;;  %p39_p4 = scmp.ge.s32.totalorder %s2451_s24, 2 }
  0x11   : > { %p642_p5 = scmp.lt.s32.totalorder (!%p553_p3), %s2016_s19, 1  ;;  %p646_p6 = scmp.lt.s32.totalorder (!%p553_p3), %s2012_s18, 1 }
  0x12   : > { %s2453_s24 = smov (%p39_p4, %s2451_s24), 0  ;;  %556 = sbr.rel (%p553_p3) target bundleno = 2963 (0xb93), region = 80 }
  0x13   : > { %2424 = sst [smem:[#allocation8_spill]] %s2453_s24  ;;  %s2425_s0 = sld [smem:[#allocation9_spill]] (!%p553_p3) }
  0x14   : > { %s2426_s1 = sld [smem:[#allocation10_spill]] (!%p553_p3)  ;;  %s2427_s3 = sld [smem:[#allocation11_spill]] (!%p553_p3) }
  0x15   : > { %s2428_s7 = sld [smem:[#allocation12_spill]] (!%p553_p3)  ;;  %s2430_s17 = sld [smem:[#allocation14_spill]] (!%p553_p3) }
  0x16   : > { %s2431_s20 = sld [smem:[#allocation17_spill]] (!%p553_p3) }
  0x19   : > { %s2455_s19 = smov (!%p642_p5, %s2016_s19), 1 }
  0x1a   : > { %s2154_s25 = scalar_select %p646_p6, %s2012_s18, 1 }
  0x1b   : > { %s1744_s26 = sshll.u32 %s2455_s19, 3  ;;  %s2432_s18 = sld [smem:[#allocation3_spill]] }
  0x1c   : > { %s645_s29 = scalar_lea.vmem %s2425_s0, %s1744_s26  ;;  %s1790_s30 = sshll.u32 %s2154_s25, 4 }
  0x1d   : > { %s650_s24 = scalar_lea.vmem %s2426_s1, %s1790_s30  ;;  %s2170_s13 = scalar_lea.vmem %s2427_s3, %s1790_s30 }
  0x1e   : > { %s2187_s23 = scalar_lea.vmem %s2428_s7, %s1790_s30  ;;  %s1793_s3 = sshll.u32 %s2154_s25, 5 }
  0x1f   : > { %s683_s15 = scalar_lea.vmem %s2400_s10, %s2154_s25  ;;  %s2201_s0 = scalar_lea.vmem %s2399_s9, %s1793_s3 }
  0x20   : > { %s686_s1 = scalar_lea.vmem %s2401_s11, %s2154_s25  ;;  %s689_s7 = scalar_lea.vmem %s2430_s17, %s2154_s25 }
  0x21   : > { %s2214_s8 = scalar_lea.vmem %s2431_s20, %s1744_s26  ;;  %p1754_p7 = scmp.ne.s32.totalorder %s2432_s18, 0 }
  0x22   : > { %v699_v0 = vld [vmem:[%s645_s29] sm:$0xff] (!%p1754_p7)  ;;  %vm700_vm0 = vcmask (!%p1754_p7), 261120  }
  0x23   : > { %698 = sbr.rel (%p1754_p7) target bundleno = 42 (0x2a), region = 84  ;;  %701 = vst.msk [vmem:[#allocation2] sm:$0xff] (!%p1754_p7), %vm700_vm0, %v699_v0 }
  0x2a PF: > { %v1958_v1 = vld [vmem:[%s650_s24] sm:$0xff]   ;;  %v2030_v2 = vmov 0.0   ;;  %v1959_v3 = vld [vmem:[%s650_s24 + $0x8] sm:$0xff]   ;;  %vm2031_vm1 = vmmov 0   ;;  %vm727_vm2 = vcmask 261120   ;;  %s2433_s24 = scalar_lea.vmem %s2392_s2, %s2154_s25  ;;  %s2032_s26 = smov 104  }
  0x2b   : > { %1824 = vmatprep.subr.bf16.mxu0 %v2030_v2  ;;  %1832 = vmatprep.subr.bf16.mxu1 %v2030_v2  ;;  %v2221_v4 = vld [vmem:[#allocation2] sm:$0xff]  ;;  %s2033_s29 = smov 120   ;;  %s2034_s17 = smov 112   ;;  %vm788_vm3 = vcmask 64512   ;;  %vm1035_vm4 = vcmask 1043456   ;;  %vm1236_vm5 = vcmask 130048  }
  0x2c   : > { %1825 = vmatpush3.bf16.msra.mxu0 %v1958_v1  ;;  %1828 = vmatprep.mubr.msk.bf16.mxu0 %vm2031_vm1, %v2030_v2  ;;  %v703_v5 = vpack.c.bf16 %v2221_v4, %v2221_v4  ;;  %v1755_v6 = vld [vmem:[%s2433_s24] ss:$0 sm:$0xff]  ;;  %s2035_s19 = smov 96   ;;  %s2036_s27 = smov 64   ;;  %vm1238_vm6 = vcmask 195584   ;;  %vm1446_vm7 = vcmask 523264  }
  0x2d   : > { %1826 = vmatprep.subr.bf16.mxu0 %v2030_v2  ;;  %1834 = vmatprep.mubr.msk.bf16.mxu1 %vm2031_vm1, %v2030_v2  ;;  %s2037_s28 = smov 8   ;;  %s2038_s12 = smov 16  }
  0x2e   : > { %s2039_s16 = smov 24   ;;  %s2434_s21 = scalar_lea.vmem %s2394_s4, %s2154_s25 }
  0x2f   : > { %s2435_s22 = scalar_lea.vmem %s2395_s5, %s2154_s25  ;;  %s2436_s20 = scalar_lea.vmem %s2396_s6, %s2154_s25 }
  0x30   : > { %1827 = vmatpush3.bf16.msra.mxu0 %v1959_v3 }
  0x31   : > { %1838 = vmatprep.subr.bf16.mxu0 %v2030_v2 }
  0x33   : > { %1829 = vmatmul.mubr.msk.bf16.vlgmr.msra.gmra.mrb[0].mxu0 %vm727_vm2, %v703_v5 }
  0x34   : > { %1840 = vmatprep.mubr.msk.bf16.mxu0 %vm2031_vm1, %v2030_v2 }
 0x106   : > { %v765_v7 = vpop.f32.mrb[0].mxu0 }
 0x107   : > { %v766_v8 = vadd.f32 %v1755_v6, %v765_v7  ;;  %v1830_v9 = vpop.f32.mrb[1].mxu0 }
 0x108   : > { %v768_v10 = vpop.f32.mrb[2].mxu0 }
 0x109   : > { %778 = vrot.lane.b32.xlu1 %v766_v8, %s2032_s26  ;;  %772 = vrot.lane.b32.xlu0 %v766_v8, %s2033_s29  ;;  %v1831_v11 = vpop.f32.mrb[3].mxu0  ;;  %v2237_v12 = vpack.c.bf16 %v766_v8, %v766_v8  ;;  %s2437_s29 = sld [smem:[#allocation13_spill]] }
 0x10d   : > { %775 = vrot.lane.b32.xlu0 %v766_v8, %s2034_s17  ;;  %786 = vrot.lane.b32.xlu1 %v2237_v12, %s2035_s19 }
 0x10f   : > { %s2438_s17 = scalar_lea.vmem %s2437_s29, %s2154_s25 }
 0x17b   : > { %v779_v13 = vpop.permute.xlu1 %778  ;;  %v773_v14 = vpop.permute.xlu0 %772 }
 0x17c   : > { %v782_v15 = vpack.c.bf16 %v773_v14, %v773_v14  ;;  %v2240_v18 = vpack.c.bf16 %v779_v13, %v779_v13 }
 0x17e   : > { %836 = vrot.lane.b32.xlu0 %v782_v15, %s2035_s19 }
 0x17f   : > { %v776_v16 = vpop.permute.xlu0 %775  ;;  %v787_v17 = vpop.permute.xlu1 %786 }
 0x180   : > { %v2242_v19 = vpack.c.bf16 %v776_v16, %v776_v16  ;;  %v793_v20 = vsel %vm788_vm3, %v787_v17, 0 }
 0x181   : > { %1833 = vmatpush3.bf16.xpose.msra.mxu1 %v793_v20 }
 0x182   : > { %934 = vrot.lane.b32.xlu0 %v2240_v18, %s2035_s19  ;;  %885 = vrot.lane.b32.xlu1 %v2242_v19, %s2035_s19 }
 0x183   : > { %1844 = vmatprep.subr.bf16.mxu1 %v2030_v2 }
 0x188   : > { %1835 = vmatmul.mubr.msk.bf16.vlgmr.msra.gmra.mrb[0].mxu1 %vm788_vm3, %v2237_v12 }
 0x189   : > { %1846 = vmatprep.mubr.msk.bf16.mxu1 %vm2031_vm1, %v2030_v2 }
 0x1f0   : > { %v837_v21 = vpop.permute.xlu0 %836 }
 0x1f1   : > { %v842_v22 = vsel %vm788_vm3, %v837_v21, 0 }
 0x1f2   : > { %1839 = vmatpush3.bf16.xpose.msra.mxu0 %v842_v22 }
 0x1f3   : > { %1850 = vmatprep.subr.bf16.mxu0 %v2030_v2 }
 0x1f4   : > { %v886_v23 = vpop.permute.xlu1 %885  ;;  %v935_v25 = vpop.permute.xlu0 %934 }
 0x1f5   : > { %v891_v24 = vsel %vm788_vm3, %v886_v23, 0  ;;  %v940_v26 = vsel %vm788_vm3, %v935_v25, 0 }
 0x1f6   : > { %1845 = vmatpush3.bf16.xpose.msra.mxu1 %v891_v24 }
 0x1f7   : > { %1856 = vmatprep.subr.bf16.mxu1 %v2030_v2 }
 0x1f9   : > { %1841 = vmatmul.mubr.msk.bf16.vlgmr.msra.gmra.mrb[4].mxu0 %vm788_vm3, %v782_v15 }
 0x1fa   : > { %1851 = vmatpush3.bf16.xpose.msra.mxu0 %v940_v26  ;;  %1852 = vmatprep.mubr.msk.bf16.mxu0 %vm2031_vm1, %v2030_v2 }
 0x1fb   : > { %1862 = vmatprep.subr.bf16.mxu0 %v2030_v2 }
 0x1fd   : > { %1847 = vmatmul.mubr.msk.bf16.vlgmr.msra.gmra.mrb[4].mxu1 %vm788_vm3, %v2242_v19 }
 0x1fe   : > { %1858 = vmatprep.mubr.msk.bf16.mxu1 %vm2031_vm1, %v2030_v2 }
 0x201   : > { %1853 = vmatmul.mubr.msk.bf16.vlgmr.msra.gmra.mrb[8].mxu0 %vm788_vm3, %v2240_v18 }
 0x202   : > { %1864 = vmatprep.mubr.msk.bf16.mxu0 %vm2031_vm1, %v2030_v2 }
 0x25b   : > { %v829_v27 = vpop.f32.mrb[0].mxu1 }
 0x25c   : > { %v1836_v28 = vpop.f32.mrb[1].mxu1  ;;  %v982_v29 = vsel %vm788_vm3, %v829_v27, -inf }
 0x25d   : > { %983 = vmax.xlane.f32.xlu1 %v982_v29  ;;  %v832_v30 = vpop.f32.mrb[2].mxu1 }
 0x25e   : > { %v1837_v31 = vpop.f32.mrb[3].mxu1 }
 0x2cc   : > { %v878_v32 = vpop.f32.mrb[4].mxu0 }
 0x2cd   : > { %v1842_v33 = vpop.f32.mrb[5].mxu0  ;;  %v985_v34 = vsel %vm788_vm3, %v878_v32, -inf }
 0x2ce   : > { %986 = vmax.xlane.f32.xlu0 %v985_v34  ;;  %v881_v35 = vpop.f32.mrb[6].mxu0  ;;  %v1960_v33 = vld [vmem:[%s2170_s13] sm:$0xff]   ;;  %v1961_v34 = vld [vmem:[%s2170_s13 + $0x8] sm:$0xff]   ;;  %s2440_s13 = sld [smem:[#allocation3_spill]] }
 0x2cf   : > { %v1843_v36 = vpop.f32.mrb[7].mxu0 }
 0x2d0   : > { %v927_v37 = vpop.f32.mrb[4].mxu1 }
 0x2d1   : > { %v1848_v38 = vpop.f32.mrb[5].mxu1  ;;  %v988_v39 = vsel %vm788_vm3, %v927_v37, -inf }
 0x2d2   : > { %v930_v40 = vpop.f32.mrb[6].mxu1  ;;  %989 = vmax.xlane.f32.xlu0 %v988_v39 }
 0x2d3   : > { %v1849_v41 = vpop.f32.mrb[7].mxu1 }
 0x2d4   : > { %v976_v42 = vpop.f32.mrb[8].mxu0  ;;  %p1785_p8 = scmp.ne.s32.totalorder %s2440_s13, 1 }
 0x2d5   : > { %v1854_v43 = vpop.f32.mrb[9].mxu0  ;;  %v991_v44 = vsel %vm788_vm3, %v976_v42, -inf }
 0x2d6   : > { %992 = vmax.xlane.f32.xlu1 %v991_v44  ;;  %v979_v45 = vpop.f32.mrb[10].mxu0 }
 0x2d7   : > { %v1855_v46 = vpop.f32.mrb[11].mxu0 }
 0x2e7   : > { %1079 = vrot.lane.b32.xlu1 %v782_v15, %s2036_s27 }
 0x2e8   : > { %1030 = vrot.lane.b32.xlu0 %v2237_v12, %s2036_s27 }
 0x2ea   : > { %v984_v47 = vpop.xlane.xlu1 %983 }
 0x2eb   : > { %v994_v48 = vsub.f32 %v829_v27, %v984_v47 }
 0x2ed   : > { %v998_v49 = vmul.f32 1.442695, %v994_v48 }
 0x2ef   : > { %1968 = vpow2.f32 %v998_v49 }
 0x2f9   : > { %v1969_v50 = vpop.eup %1968 }
 0x2fa   : > { %v1006_v51 = vsel %vm788_vm3, %v1969_v50, 0.0 }
 0x307   : > { %1007 = vadd.xlane.f32.xlu0 %v1006_v51 }
 0x35b   : > { %v987_v52 = vpop.xlane.xlu0 %986 }
 0x35c   : > { %v995_v53 = vsub.f32 %v878_v32, %v987_v52 }
 0x35e   : > { %v1000_v54 = vmul.f32 1.442695, %v995_v53 }
 0x35f   : > { %v990_v55 = vpop.xlane.xlu0 %989 }
 0x360   : > { %1970 = vpow2.f32 %v1000_v54  ;;  %v996_v56 = vsub.f32 %v927_v37, %v990_v55  ;;  %v1767_v54 = vld [vmem:[%s2434_s21] ss:$0 sm:$0xff] }
 0x362   : > { %v1002_v57 = vmul.f32 1.442695, %v996_v56 }
 0x363   : > { %v1031_v58 = vpop.permute.xlu0 %1030  ;;  %v993_v59 = vpop.xlane.xlu1 %992 }
 0x364   : > { %1972 = vpow2.f32 %v1002_v57  ;;  %v1037_v60 = vsel %vm1035_vm4, %v1031_v58, 0  ;;  %v997_v61 = vsub.f32 %v976_v42, %v993_v59 }
 0x365   : > { %1857 = vmatpush3.bf16.msra.mxu1 %v1037_v60 }
 0x366   : > { %v1004_v62 = vmul.f32 1.442695, %v997_v61  ;;  %1868 = vmatprep.subr.bf16.mxu1 %v2030_v2 }
 0x367   : > { %v1080_v63 = vpop.permute.xlu1 %1079 }
 0x368   : > { %1974 = vpow2.f32 %v1004_v62  ;;  %v1085_v0 = vsel %vm1035_vm4, %v1080_v63, 0 }
 0x369   : > { %1863 = vmatpush3.bf16.msra.mxu0 %v1085_v0 }
 0x36a   : > { %v1971_v1 = vpop.eup %1970  ;;  %1874 = vmatprep.subr.bf16.mxu0 %v2030_v2 }
 0x36b   : > { %v1009_v3 = vsel %vm788_vm3, %v1971_v1, 0.0 }
 0x36c   : > { %1010 = vadd.xlane.f32.xlu1 %v1009_v3 }
 0x36e   : > { %v1973_v5 = vpop.eup %1972 }
 0x36f   : > { %v1012_v6 = vsel %vm788_vm3, %v1973_v5, 0.0 }
 0x370   : > { %1013 = vadd.xlane.f32.xlu0 %v1012_v6  ;;  %v1963_v6 = vld [vmem:[%s2187_s23 + $0x8] sm:$0xff]  }
 0x372   : > { %v1975_v7 = vpop.eup %1974 }
 0x373   : > { %v1015_v8 = vsel %vm788_vm3, %v1975_v7, 0.0 }
 0x374   : > { %1016 = vadd.xlane.f32.xlu1 %v1015_v8 }
 0x385   : > { %1127 = vrot.lane.b32.xlu1 %v2242_v19, %s2036_s27 }
 0x386   : > { %1175 = vrot.lane.b32.xlu0 %v2240_v18, %s2036_s27 }
 0x394   : > { %v1008_v9 = vpop.xlane.xlu0 %1007 }
 0x395   : > { %1976 = vrcp.f32 %v1008_v9 }
 0x39f   : > { %v1977_v10 = vpop.eup %1976 }
 0x3a0   : > { %v1022_v11 = vmul.f32 %v1977_v10, %v1969_v50 }
 0x3a2   : > { %v1026_v12 = vpack.c.bf16 %v1022_v11, %v1022_v11 }
 0x3a4   : > { %1859 = vmatmul.mubr.msk.bf16.vlgmr.msra.gmra.mrb[8].mxu1 %vm788_vm3, %v1026_v12  ;;  %v1771_v12 = vld [vmem:[%s2435_s22] ss:$0 sm:$0xff] }
 0x3a5   : > { %1870 = vmatprep.mubr.msk.bf16.mxu1 %vm2031_vm1, %v2030_v2 }
 0x3f9   : > { %v1011_v13 = vpop.xlane.xlu1 %1010 }
 0x3fa   : > { %1978 = vrcp.f32 %v1011_v13 }
 0x3fd   : > { %v1014_v14 = vpop.xlane.xlu0 %1013 }
 0x3fe   : > { %1980 = vrcp.f32 %v1014_v14  ;;  %v1772_v14 = vld [vmem:[%s2436_s20] ss:$0 sm:$0xff] }
 0x401   : > { %v1017_v15 = vpop.xlane.xlu1 %1016  ;;  %v1176_v18 = vpop.permute.xlu0 %1175 }
 0x402   : > { %1982 = vrcp.f32 %v1017_v15  ;;  %v1181_v24 = vsel %vm1035_vm4, %v1176_v18, 0  ;;  %v1967_v18 = vld [vmem:[%s2201_s0 + $0x18] sm:$0xff]  }
 0x404   : > { %v1979_v16 = vpop.eup %1978 }
 0x405   : > { %v1023_v17 = vmul.f32 %v1979_v16, %v1971_v1  ;;  %v1128_v19 = vpop.permute.xlu1 %1127 }
 0x406   : > { %v1133_v20 = vsel %vm1035_vm4, %v1128_v19, 0  ;;  %v1966_v19 = vld [vmem:[%s2201_s0 + $0x10] sm:$0xff]  }
 0x407   : > { %1869 = vmatpush3.bf16.msra.mxu1 %v1133_v20  ;;  %v1027_v21 = vpack.c.bf16 %v1023_v17, %v1023_v17  ;;  %v1773_v20 = vld [vmem:[%s2438_s17] ss:$0 sm:$0xff] }
 0x408   : > { %v1981_v22 = vpop.eup %1980  ;;  %1880 = vmatprep.subr.bf16.mxu1 %v2030_v2 }
 0x409   : > { %v1024_v23 = vmul.f32 %v1981_v22, %v1973_v5  ;;  %1865 = vmatmul.mubr.msk.bf16.vlgmr.msra.gmra.mrb[12].mxu0 %vm788_vm3, %v1027_v21  ;;  %v1962_v5 = vld [vmem:[%s2187_s23] sm:$0xff]   ;;  %s2442_s23 = sld [smem:[#allocation16_spill]] (!%p1785_p8) }
 0x40a   : > { %1875 = vmatpush3.bf16.msra.mxu0 %v1181_v24  ;;  %1876 = vmatprep.mubr.msk.bf16.mxu0 %vm2031_vm1, %v2030_v2 }
 0x40b   : > { %v1028_v25 = vpack.c.bf16 %v1024_v23, %v1024_v23  ;;  %1888 = vmatprep.subr.bf16.mxu0 %v2030_v2 }
 0x40c   : > { %v1983_v26 = vpop.eup %1982 }
 0x40d   : > { %v1025_v27 = vmul.f32 %v1983_v26, %v1975_v7  ;;  %1871 = vmatmul.mubr.msk.bf16.vlgmr.msra.gmra.mrb[12].mxu1 %vm788_vm3, %v1028_v25  ;;  %v1965_v7 = vld [vmem:[%s2201_s0 + $0x8] sm:$0xff]  }
 0x40e   : > { %1884 = vmatprep.mubr.msk.bf16.mxu1 %vm2031_vm1, %v2030_v2  ;;  %1881 = vmatpush3.bf16.msra.mxu1 %v1960_v33 }
 0x40f   : > { %v1029_v28 = vpack.c.bf16 %v1025_v27, %v1025_v27  ;;  %1882 = vmatprep.subr.bf16.mxu1 %v2030_v2 }
 0x411   : > { %1877 = vmatmul.mubr.msk.bf16.vlgmr.msra.gmra.mrb[16].mxu0 %vm788_vm3, %v1029_v28 }
 0x412   : > { %1892 = vmatprep.mubr.msk.bf16.mxu0 %vm2031_vm1, %v2030_v2  ;;  %1883 = vmatpush3.bf16.msra.mxu1 %v1961_v34 }
 0x413   : > { %1896 = vmatprep.subr.bf16.mxu1 %v2030_v2  ;;  %1889 = vmatpush3.bf16.msra.mxu0 %v1962_v5 }
 0x414   : > { %1890 = vmatprep.subr.bf16.mxu0 %v2030_v2 }
 0x417   : > { %1891 = vmatpush3.bf16.msra.mxu0 %v1963_v6 }
 0x477   : > { %v1073_v29 = vpop.f32.mrb[8].mxu1 }
 0x478   : > { %v1860_v30 = vpop.f32.mrb[9].mxu1 }
 0x479   : > { %v1076_v31 = vpop.f32.mrb[10].mxu1 }
 0x47a   : > { %v1861_v32 = vpop.f32.mrb[11].mxu1 }
 0x4dc   : > { %v1121_v35 = vpop.f32.mrb[12].mxu0 }
 0x4dd   : > { %1224 = vrot.lane.b32.xlu1 %v1121_v35, %s2037_s28  ;;  %v1866_v36 = vpop.f32.mrb[13].mxu0 }
 0x4de   : > { %v1124_v37 = vpop.f32.mrb[14].mxu0 }
 0x4df   : > { %v1867_v38 = vpop.f32.mrb[15].mxu0 }
 0x4e0   : > { %v1169_v39 = vpop.f32.mrb[12].mxu1 }
 0x4e1   : > { %1228 = vrot.lane.b32.xlu0 %v1169_v39, %s2038_s12  ;;  %v1872_v40 = vpop.f32.mrb[13].mxu1 }
 0x4e2   : > { %v1172_v41 = vpop.f32.mrb[14].mxu1 }
 0x4e3   : > { %v1873_v42 = vpop.f32.mrb[15].mxu1 }
 0x4e4   : > { %v1217_v43 = vpop.f32.mrb[16].mxu0 }
 0x4e5   : > { %1232 = vrot.lane.b32.xlu1 %v1217_v43, %s2039_s16  ;;  %v1878_v44 = vpop.f32.mrb[17].mxu0 }
 0x4e6   : > { %v1220_v45 = vpop.f32.mrb[18].mxu0  ;;  %v1783_v44 = vld [vmem:[%s686_s1] ss:$0 sm:$0xff]  ;;  %s2441_s1 = sld [smem:[#allocation15_spill]] (!%p1785_p8) }
 0x4e7   : > { %v1879_v46 = vpop.f32.mrb[19].mxu0 }
 0x4e8   : > { %v1784_v46 = vld [vmem:[%s689_s7] ss:$0 sm:$0xff] }
 0x54f   : > { %v1225_v47 = vpop.permute.xlu1 %1224 }
 0x550   : > { %v1235_v49 = vsel %vm788_vm3, %v1073_v29, %v1225_v47 }
 0x553   : > { %v1229_v48 = vpop.permute.xlu0 %1228 }
 0x554   : > { %v1237_v50 = vsel %vm1236_vm5, %v1235_v49, %v1229_v48 }
 0x557   : > { %v1233_v51 = vpop.permute.xlu1 %1232 }
 0x558   : > { %v1239_v52 = vsel %vm1238_vm6, %v1237_v50, %v1233_v51 }
 0x559   : > { %v1240_v53 = vpack.c.bf16 %v1239_v52, %v1239_v52 }
 0x55b   : > { %1885 = vmatmul.mubr.msk.bf16.vlgmr.msra.gmra.mrb[16].mxu1 %vm727_vm2, %v1240_v53 }
 0x55c   : > { %1904 = vmatprep.mubr.msk.bf16.mxu1 %vm2031_vm1, %v2030_v2 }
 0x62e   : > { %v1301_v55 = vpop.f32.mrb[16].mxu1 }
 0x62f   : > { %v1302_v56 = vadd.f32 %v1767_v54, %v1301_v55  ;;  %v1886_v57 = vpop.f32.mrb[17].mxu1 }
 0x630   : > { %v1304_v58 = vpop.f32.mrb[18].mxu1 }
 0x631   : > { %v1887_v59 = vpop.f32.mrb[19].mxu1  ;;  %v1307_v60 = vadd.f32 %v1302_v56, %v2221_v4  ;;  %v1964_v4 = vld [vmem:[%s2201_s0] sm:$0xff]  }
 0x632   : > { %1897 = vmatpush3.bf16.msra.mxu1 %v1964_v4  ;;  %v1786_v59 = vld [vmem:[%s2441_s1] ss:$0 sm:$0xff] (!%p1785_p8) }
 0x633   : > { %v1310_v61 = vsel %vm727_vm2, %v1307_v60, 0.0  ;;  %1898 = vmatprep.subr.bf16.mxu1 %v2030_v2 }
 0x634   : > { %1311 = vadd.xlane.f32.xlu0 %v1310_v61  ;;  %v1787_v61 = vld [vmem:[%s2442_s23] ss:$0 sm:$0xff] (!%p1785_p8) }
 0x636   : > { %1899 = vmatpush3.bf16.msra.mxu1 %v1965_v7 }
 0x637   : > { %1900 = vmatprep.subr.bf16.mxu1 %v2030_v2 }
 0x63a   : > { %1901 = vmatpush3.bf16.msra.mxu1 %v1966_v19 }
 0x63b   : > { %1902 = vmatprep.subr.bf16.mxu1 %v2030_v2  ;;  %v1777_v2 = vld [vmem:[%s683_s15] ss:$0 sm:$0xff] }
 0x63e   : > { %1903 = vmatpush3.bf16.msra.mxu1 %v1967_v18 }
 0x6c1   : > { %v1312_v62 = vpop.xlane.xlu0 %1311 }
 0x6c2   : > { %v1314_v63 = vmul.f32 0.03125, %v1312_v62 }
 0x6c4   : > { %v1315_v0 = vsub.f32 %v1307_v60, %v1314_v63 }
 0x6c6   : > { %v1316_v1 = vmul.f32 %v1315_v0, %v1315_v0 }
 0x6c8   : > { %v1317_v3 = vsel %vm727_vm2, %v1316_v1, 0.0 }
 0x6c9   : > { %1318 = vadd.xlane.f32.xlu1 %v1317_v3 }
 0x756   : > { %v1319_v8 = vpop.xlane.xlu1 %1318 }
 0x757   : > { %v1320_v9 = vmul.f32 0.03125, %v1319_v8 }
 0x759   : > { %v1321_v10 = vadd.f32 1e-05, %v1320_v9 }
 0x75b   : > { %1984 = vrsqrt.f32 %v1321_v10 }
 0x765   : > { %v1985_v11 = vpop.eup %1984 }
 0x766   : > { %v1323_v13 = vmul.f32 %v1985_v11, %v1315_v0 }
 0x768   : > { %v1330_v15 = vmul.f32 %v1771_v12, %v1323_v13 }
 0x76a   : > { %v1337_v16 = vadd.f32 %v1772_v14, %v1330_v15 }
 0x76c   : > { %v1338_v17 = vpack.c.bf16 %v1337_v16, %v1337_v16 }
 0x76e   : > { %1893 = vmatmul.mubr.msk.bf16.vlgmr.msra.gmra.mrb[20].mxu0 %vm727_vm2, %v1338_v17 }
 0x841   : > { %v1399_v21 = vpop.f32.mrb[20].mxu0 }
 0x842   : > { %v1400_v22 = vadd.f32 %v1773_v20, %v1399_v21  ;;  %v1894_v23 = vpop.f32.mrb[21].mxu0 }
 0x843   : > { %v1402_v24 = vpop.f32.mrb[22].mxu0 }
 0x844   : > { %v1405_v25 = vmax.f32 %v1400_v22, 0.0  ;;  %v1895_v26 = vpop.f32.mrb[23].mxu0 }
 0x846   : > { %v1406_v27 = vpack.c.bf16 %v1405_v25, %v1405_v25 }
 0x848   : > { %1905 = vmatmul.mubr.msk.bf16.vlgmr.msra.gmra.mrb[20].mxu1 %vm1446_vm7, %v1406_v27 }
 0x91b   : > { %v1484_v28 = vpop.f32.mrb[20].mxu1 }
 0x91c   : > { %v1485_v29 = vadd.f32 %v1777_v2, %v1484_v28  ;;  %v1906_v30 = vpop.f32.mrb[21].mxu1 }
 0x91d   : > { %v1487_v31 = vpop.f32.mrb[22].mxu1 }
 0x91e   : > { %v1907_v32 = vpop.f32.mrb[23].mxu1  ;;  %v1490_v33 = vadd.f32 %v1485_v29, %v1337_v16 }
 0x920   : > { %v1493_v34 = vsel %vm727_vm2, %v1490_v33, 0.0 }
 0x921   : > { %1494 = vadd.xlane.f32.xlu0 %v1493_v34 }
 0x9ae   : > { %v1495_v35 = vpop.xlane.xlu0 %1494 }
 0x9af   : > { %v1496_v36 = vmul.f32 0.03125, %v1495_v35 }
 0x9b1   : > { %v1497_v37 = vsub.f32 %v1490_v33, %v1496_v36 }
 0x9b3   : > { %v1498_v38 = vmul.f32 %v1497_v37, %v1497_v37 }
 0x9b5   : > { %v1499_v39 = vsel %vm727_vm2, %v1498_v38, 0.0 }
 0x9b6   : > { %1500 = vadd.xlane.f32.xlu0 %v1499_v39 }
 0xa43   : > { %v1501_v40 = vpop.xlane.xlu0 %1500 }
 0xa44   : > { %v1502_v41 = vmul.f32 0.03125, %v1501_v40 }
 0xa46   : > { %v1503_v42 = vadd.f32 1e-05, %v1502_v41 }
 0xa48   : > { %1986 = vrsqrt.f32 %v1503_v42 }
 0xa52   : > { %v1987_v43 = vpop.eup %1986 }
 0xa53   : > { %v1505_v45 = vmul.f32 %v1987_v43, %v1497_v37  ;;  %1524 = sbr.rel (%p1785_p8) target bundleno = 2963 (0xb93), region = 88 }
 0xa55   : > { %v1512_v47 = vmul.f32 %v1783_v44, %v1505_v45 }
 0xa57   : > { %v1519_v48 = vadd.f32 %v1784_v46, %v1512_v47 }
 0xa59   : > { %1520 = vst.msk [vmem:[#allocation2] sm:$0xff] %vm727_vm2, %v1519_v48  ;;  %v1527_v49 = vsel (!%p1785_p8), %vm727_vm2, %v1519_v48, 0.0 }
 0xa5a   : > { %1528 = vadd.xlane.f32.xlu0 %v1527_v49 }
 0xae7   : > { %v1529_v50 = vpop.xlane.xlu0 %1528 }
 0xae8   : > { %v1530_v51 = vmul.f32 0.03125, %v1529_v50 }
 0xaea   : > { %v1531_v52 = vsub.f32 %v1519_v48, %v1530_v51 }
 0xaec   : > { %v1532_v53 = vmul.f32 %v1531_v52, %v1531_v52 }
 0xaee   : > { %v1533_v54 = vsel %vm727_vm2, %v1532_v53, 0.0 }
 0xaef   : > { %1534 = vadd.xlane.f32.xlu0 %v1533_v54 }
 0xb7c   : > { %v1535_v55 = vpop.xlane.xlu0 %1534 }
 0xb7d   : > { %v1536_v56 = vmul.f32 0.03125, %v1535_v55 }
 0xb7f   : > { %v1537_v57 = vadd.f32 1e-05, %v1536_v56 }
 0xb81   : > { %1988 = vrsqrt.f32 %v1537_v57 }
 0xb8b   : > { %v1989_v58 = vpop.eup %1988 }
 0xb8c   : > { %v1539_v60 = vmul.f32 %v1989_v58, %v1531_v52 }
 0xb8e   : > { %v1546_v62 = vmul.f32 %v1786_v59, %v1539_v60 }
 0xb90   : > { %v1553_v63 = vadd.f32 %v1787_v61, %v1546_v62 }
 0xb92   : > { %1554 = vst.msk [vmem:[%s2214_s8] sm:$0xff] %vm727_vm2, %v1553_v63 }
 0xb93 PF: > { %s2443_s14 = sld [smem:[#allocation6_spill]]  ;;  %s2444_s18 = sld [smem:[#allocation4_spill]] }
 0xb94   : > { %s2445_s19 = sld [smem:[#allocation5_spill]]  ;;  %s2446_s20 = sld [smem:[#allocation7_spill]] }
 0xb95   : > { %s2447_s21 = sld [smem:[#allocation8_spill]] }
 0xb99   : > { %s25_s22 = sadd.s32 1, %s2443_s14  }
 0xb9a   : > { %p22_p9 = scmp.ge.s32.totalorder %s25_s22, 6  }
 0xb9c   :  { %24 = sbr.rel (!%p22_p9) target bundleno = 10 (0xa), region = 154 }

</bundles_post_ra>
